<compile_context>
chip_gen: v7x
topology: tpu7x:2x2x1
jax: 0.10.0
libtpu: 0.0.40
codegen_flags: <defaults>
</compile_context>

<pallas_src>
import jax
import jax.numpy as jnp
from jax.experimental import pallas as pl
from jax.experimental.pallas import tpu as pltpu


def _round_up(x, m):
    return (x + m - 1) // m * m


# ----------------------------------------------------------------------------
# Kernel 1: fused conv-as-matmul (+ bias) and BN partial statistics
# ----------------------------------------------------------------------------
def _conv_bn_stats_kernel(p_ref, w_ref, b_ref, y_ref, s_ref, acc_ref):
    # p_ref: (tm, tk) patches      w_ref: (tk, Cpad) weights   b_ref: (1, Cpad)
    # y_ref: (tm, Cpad) conv out   s_ref: (2, Cpad) per-row-tile partial stats
    # acc_ref: (tm, Cpad) fp32 accumulator, persistent across the K grid axis
    kk = pl.program_id(1)

    @pl.when(kk == 0)
    def _():
        acc_ref[...] = jnp.zeros_like(acc_ref)

    acc_ref[...] += jnp.dot(p_ref[...], w_ref[...],
                            preferred_element_type=jnp.float32)

    @pl.when(kk == pl.num_programs(1) - 1)
    def _():
        y = acc_ref[...] + b_ref[...]                       # fp32
        y_ref[...] = y.astype(y_ref.dtype)
        s_ref[...] = jnp.concatenate(
            [jnp.sum(y, axis=0, keepdims=True),
             jnp.sum(y * y, axis=0, keepdims=True)], axis=0)


# ----------------------------------------------------------------------------
# Kernel 2: elementwise normalize + affine  (out = y * scale + shift)
# ----------------------------------------------------------------------------
def _bn_norm_kernel(y_ref, scale_ref, shift_ref, o_ref):
    y = y_ref[...].astype(jnp.float32)
    o_ref[...] = (y * scale_ref[...] + shift_ref[...]).astype(o_ref.dtype)


# ----------------------------------------------------------------------------
# Glue: im2col (pure slicing / reshapes, no compute)
# ----------------------------------------------------------------------------
def _im2col(x, kh, kw, stride, padding, dilation):
    n, cin, h, w = x.shape
    xp = jnp.pad(x, ((0, 0), (0, 0), (padding, padding), (padding, padding)))
    ho = (h + 2 * padding - dilation * (kh - 1) - 1) // stride + 1
    wo = (w + 2 * padding - dilation * (kw - 1) - 1) // stride + 1
    cols = []
    for i in range(kh):
        for j in range(kw):
            sl = xp[:, :,
                    i * dilation: i * dilation + stride * (ho - 1) + 1: stride,
                    j * dilation: j * dilation + stride * (wo - 1) + 1: stride]
            cols.append(sl)                          # (N, Cin, Ho, Wo)
    p = jnp.stack(cols, axis=2)                      # (N, Cin, kh*kw, Ho, Wo)
    p = p.transpose(0, 3, 4, 1, 2)                   # (N, Ho, Wo, Cin, kh*kw)
    return p.reshape(n * ho * wo, cin * kh * kw), ho, wo


# ----------------------------------------------------------------------------
# Wrapper: conv2d + BatchNorm2d (training-mode batch stats), NCHW in / out
# ----------------------------------------------------------------------------
def conv2d_batchnorm(x, weight, bias, gamma, beta, *, stride=1, padding=1,
                     dilation=1, eps=1e-5, compute_dtype=jnp.bfloat16,
                     tile_m=512, tile_k=512):
    n, cin, h, w = x.shape
    cout, _, kh, kw = weight.shape

    patches, ho, wo = _im2col(x, kh, kw, stride, padding, dilation)
    m = n * ho * wo
    k = cin * kh * kw

    # --- tiling choices ------------------------------------------------------
    cpad = _round_up(cout, 128)                 # lane-dense stores / MXU width
    tm = min(tile_m, _round_up(m, 8))           # big row tiles (sweepable)
    m_pad = _round_up(m, tm)
    if k <= tile_k:                             # small K: single K step
        tk, k_pad = k, k
    else:                                       # big K: tile (tk multiple of 128)
        tk = tile_k
        k_pad = _round_up(k, tk)
    m_tiles = m_pad // tm
    k_tiles = k_pad // tk

    # --- operand prep (cast to MXU dtype, pad to lane-dense shapes) -----------
    patches = jnp.pad(patches, ((0, m_pad - m), (0, k_pad - k)))
    patches = patches.astype(compute_dtype)
    w2d = jnp.pad(weight.reshape(cout, k).T.astype(jnp.float32),
                  ((0, k_pad - k), (0, cpad - cout))).astype(compute_dtype)
    b_vec = (jnp.zeros((cout,), jnp.float32) if bias is None
             else bias.astype(jnp.float32))
    b_vec = jnp.pad(b_vec, (0, cpad - cout))
    b2d = b_vec.reshape(1, cpad)

    store_dtype = compute_dtype                 # y stored once, read once
    vmem_limit = 48 * 1024 * 1024

    itemsize = jnp.dtype(compute_dtype).itemsize
    cost = pl.CostEstimate(
        flops=2 * m_pad * k_pad * cpad,
        transcendentals=0,
        bytes_accessed=(m_pad * k_pad + k_pad * cpad + m_pad * cpad) * itemsize)

    # --- pass 1: conv matmul + bias, fused with BN partial statistics ---------
    y, partials = pl.pallas_call(
        _conv_bn_stats_kernel,
        out_shape=(jax.ShapeDtypeStruct((m_pad, cpad), store_dtype),
                   jax.ShapeDtypeStruct((m_tiles, 2, cpad), jnp.float32)),
        grid_spec=pltpu.PrefetchScalarGridSpec(
            num_scalar_prefetch=0,
            grid=(m_tiles, k_tiles),
            in_specs=[pl.BlockSpec((tm, tk), lambda i, kk: (i, kk)),
                      pl.BlockSpec((tk, cpad), lambda i, kk: (kk, 0)),
                      pl.BlockSpec((1, cpad), lambda i, kk: (0, 0))],
            out_specs=[pl.BlockSpec((tm, cpad), lambda i, kk: (i, 0)),
                       pl.BlockSpec((None, 2, cpad), lambda i, kk: (i, 0, 0))],
            scratch_shapes=[pltpu.VMEM((tm, cpad), jnp.float32)]),
        compiler_params=pltpu.CompilerParams(
            dimension_semantics=("parallel", "arbitrary"),
            vmem_limit_bytes=vmem_limit),
        cost_estimate=cost,
    )(patches, w2d, b2d)

    # --- combine partials, compute scale/shift (tiny, in XLA) -----------------
    sums = jnp.sum(partials, axis=0)                     # (2, cpad), fp32
    # Padded patch rows produce exactly y == bias; subtract their contribution
    # analytically instead of masking inside the kernel.
    pad_rows = jnp.float32(m_pad - m)
    s1 = sums[0] - pad_rows * b_vec
    s2 = sums[1] - pad_rows * b_vec * b_vec
    mean = s1 / m
    var = jnp.maximum(s2 / m - mean * mean, 0.0)         # biased var (PyTorch BN)
    rstd = jax.lax.rsqrt(var + eps)
    gamma_p = jnp.pad(gamma.astype(jnp.float32), (0, cpad - cout))
    beta_p = jnp.pad(beta.astype(jnp.float32), (0, cpad - cout))
    scale = (gamma_p * rstd).reshape(1, cpad)
    shift = (beta_p - mean * gamma_p * rstd).reshape(1, cpad)

    # --- pass 2: normalize + affine -------------------------------------------
    out = pl.pallas_call(
        _bn_norm_kernel,
        out_shape=jax.ShapeDtypeStruct((m_pad, cpad), jnp.float32),
        grid_spec=pltpu.PrefetchScalarGridSpec(
            num_scalar_prefetch=0,
            grid=(m_tiles,),
            in_specs=[pl.BlockSpec((tm, cpad), lambda i: (i, 0)),
                      pl.BlockSpec((1, cpad), lambda i: (0, 0)),
                      pl.BlockSpec((1, cpad), lambda i: (0, 0))],
            out_specs=pl.BlockSpec((tm, cpad), lambda i: (i, 0))),
        compiler_params=pltpu.CompilerParams(
            dimension_semantics=("parallel",),
            vmem_limit_bytes=vmem_limit),
    )(y, scale, shift)

    # back to NCHW (wrapper-side; cheap at these sizes)
    out = out[:m, :cout].reshape(n, ho, wo, cout).transpose(0, 3, 1, 2)
    return out


# ----------------------------------------------------------------------------
# Pure-JAX reference (for correctness check)
# ----------------------------------------------------------------------------
def _reference(x, weight, bias, gamma, beta, *, stride, padding, dilation, eps):
    y = jax.lax.conv_general_dilated(
        x, weight, window_strides=(stride, stride),
        padding=[(padding, padding), (padding, padding)],
        rhs_dilation=(dilation, dilation),
        dimension_numbers=("NCHW", "OIHW", "NCHW"))
    if bias is not None:
        y = y + bias[None, :, None, None]
    mean = y.mean(axis=(0, 2, 3), keepdims=True)
    var = ((y - mean) ** 2).mean(axis=(0, 2, 3), keepdims=True)
    yn = (y - mean) / jnp.sqrt(var + eps)
    return yn * gamma[None, :, None, None] + beta[None, :, None, None]


if __name__ == "__main__":
    key = jax.random.PRNGKey(0)
    k_x, k_w, k_b, k_g, k_bt = jax.random.split(key, 5)

    # conv2DBatchNorm(in_channels=4, out_channels=8, kernel_size=3,
    #                 stride=1, padding=1, dilation=1, bias=True)
    N, Cin, H, W = 2, 4, 16, 16
    Cout, KH, KW = 8, 3, 3
    stride, padding, dilation = 1, 1, 1

    x = jax.random.normal(k_x, (N, Cin, H, W), dtype=jnp.float32)
    weight = jax.random.normal(k_w, (Cout, Cin, KH, KW), dtype=jnp.float32) * 0.1
    bias = jax.random.normal(k_b, (Cout,), dtype=jnp.float32) * 0.1
    gamma = 1.0 + 0.1 * jax.random.normal(k_g, (Cout,), dtype=jnp.float32)
    beta = 0.1 * jax.random.normal(k_bt, (Cout,), dtype=jnp.float32)

    ref = _reference(x, weight, bias, gamma, beta, stride=stride,
                     padding=padding, dilation=dilation, eps=1e-5)

    # fp32 compute path: tight check against the fp32 reference.
    out_f32 = conv2d_batchnorm(x, weight, bias, gamma, beta,
                               stride=stride, padding=padding,
                               dilation=dilation, compute_dtype=jnp.float32)
    out_f32 = jax.block_until_ready(out_f32)
    assert out_f32.shape == (N, Cout, H, W)
    assert jnp.allclose(out_f32, ref, atol=1e-4, rtol=1e-4)

    # bf16 MXU path (default / fast): looser check against the fp32 reference.
    out_bf16 = conv2d_batchnorm(x, weight, bias, gamma, beta,
                                stride=stride, padding=padding,
                                dilation=dilation)
    out_bf16 = jax.block_until_ready(out_bf16)
    assert out_bf16.shape == (N, Cout, H, W)
    assert jnp.allclose(out_bf16, ref, atol=3e-2, rtol=3e-2)

    print("KERNEL_OK")
</pallas_src>

<mosaic_0001>
module attributes {stable_mosaic.version = 11 : i64} {
  func.func @_conv_bn_stats_kernel(%arg0: i32, %arg1: i32, %arg2: memref<512x36xf32, #tpu.memory_space<vmem>>, %arg3: memref<36x128xf32, #tpu.memory_space<vmem>>, %arg4: memref<1x128xf32, #tpu.memory_space<vmem>>, %arg5: memref<512x128xf32, #tpu.memory_space<vmem>>, %arg6: memref<1x2x128xf32, #tpu.memory_space<vmem>>, %arg7: memref<512x128xf32, #tpu.memory_space<vmem>>) attributes {dimension_semantics = [#tpu.dimension_semantics<parallel>, #tpu.dimension_semantics<arbitrary>], iteration_bounds = array<i64: 1, 1>, scalar_prefetch = 0 : i64, scratch_operands = 1 : i64, tpu.core_type = #tpu.core_type<tc>, window_params = [{transform_indices = @transform_0, window_bounds = array<i64: 512, 36>}, {transform_indices = @transform_1, window_bounds = array<i64: 36, 128>}, {pipeline_mode = #tpu.pipeline_mode<synchronous>, transform_indices = @transform_2, window_bounds = array<i64: 1, 128>}, {transform_indices = @transform_3, window_bounds = array<i64: 512, 128>}, {transform_indices = @transform_4, window_bounds = array<i64: 1, 2, 128>}]} {
    %c0_i32 = arith.constant 0 : i32
    %0 = arith.cmpi eq, %arg1, %c0_i32 : i32
    %1 = arith.extui %0 : i1 to i32
    %c0_i32_0 = arith.constant 0 : i32
    %2 = arith.cmpi ne, %1, %c0_i32_0 : i32
    scf.if %2 {
      %cst_10 = arith.constant 0.000000e+00 : f32
      %12 = vector.broadcast %cst_10 : f32 to vector<512x128xf32>
      %c0_11 = arith.constant 0 : index
      %c0_12 = arith.constant 0 : index
      %13 = vector.load %arg7[%c0_11, %c0_12] : memref<512x128xf32, #tpu.memory_space<vmem>>, vector<512x128xf32>
      tpu.vector_store %arg7[%c0_11, %c0_12], %12 {strides = array<i32>} : memref<512x128xf32, #tpu.memory_space<vmem>>, vector<512x128xf32>,
    } else {
    }
    %c0 = arith.constant 0 : index
    %c0_1 = arith.constant 0 : index
    %3 = vector.load %arg7[%c0, %c0_1] : memref<512x128xf32, #tpu.memory_space<vmem>>, vector<512x128xf32>
    %c0_2 = arith.constant 0 : index
    %c0_3 = arith.constant 0 : index
    %4 = vector.load %arg2[%c0_2, %c0_3] : memref<512x36xf32, #tpu.memory_space<vmem>>, vector<512x36xf32>
    %c0_4 = arith.constant 0 : index
    %c0_5 = arith.constant 0 : index
    %5 = vector.load %arg3[%c0_4, %c0_5] : memref<36x128xf32, #tpu.memory_space<vmem>>, vector<36x128xf32>
    %cst = arith.constant dense<0.000000e+00> : vector<512x128xf32>
    %6 = tpu.matmul %4, %5, %cst {dimension_numbers = #tpu.dot_dimension_numbers<[1], [0], [0], [1], [0, 0, 1, 1], [], []>} : vector<512x36xf32>, vector<36x128xf32>, vector<512x128xf32> -> vector<512x128xf32>
    %7 = arith.addf %3, %6 : vector<512x128xf32>
    %c0_6 = arith.constant 0 : index
    %c0_7 = arith.constant 0 : index
    %8 = vector.load %arg7[%c0_6, %c0_7] : memref<512x128xf32, #tpu.memory_space<vmem>>, vector<512x128xf32>
    tpu.vector_store %arg7[%c0_6, %c0_7], %7 {strides = array<i32>} : memref<512x128xf32, #tpu.memory_space<vmem>>, vector<512x128xf32>,
    %c0_i32_8 = arith.constant 0 : i32
    %9 = arith.cmpi eq, %arg1, %c0_i32_8 : i32
    %10 = arith.extui %9 : i1 to i32
    %c0_i32_9 = arith.constant 0 : i32
    %11 = arith.cmpi ne, %10, %c0_i32_9 : i32
    scf.if %11 {
      %c0_10 = arith.constant 0 : index
      %c0_11 = arith.constant 0 : index
      %12 = vector.load %arg7[%c0_10, %c0_11] : memref<512x128xf32, #tpu.memory_space<vmem>>, vector<512x128xf32>
      %c0_12 = arith.constant 0 : index
      %c0_13 = arith.constant 0 : index
      %13 = vector.load %arg4[%c0_12, %c0_13] : memref<1x128xf32, #tpu.memory_space<vmem>>, vector<1x128xf32>
      %14 = vector.broadcast %13 : vector<1x128xf32> to vector<512x128xf32>
      %15 = arith.addf %12, %14 : vector<512x128xf32>
      %c0_14 = arith.constant 0 : index
      %c0_15 = arith.constant 0 : index
      %16 = vector.load %arg5[%c0_14, %c0_15] : memref<512x128xf32, #tpu.memory_space<vmem>>, vector<512x128xf32>
      tpu.vector_store %arg5[%c0_14, %c0_15], %15 {strides = array<i32>} : memref<512x128xf32, #tpu.memory_space<vmem>>, vector<512x128xf32>,
      %cst_16 = arith.constant dense<0.000000e+00> : vector<128xf32>
      %17 = vector.multi_reduction <add>, %15, %cst_16 [0] : vector<512x128xf32> to vector<128xf32>
      %18 = vector.shape_cast %17 : vector<128xf32> to vector<1x128xf32>
      %19 = arith.mulf %15, %15 : vector<512x128xf32>
      %cst_17 = arith.constant dense<0.000000e+00> : vector<128xf32>
      %20 = vector.multi_reduction <add>, %19, %cst_17 [0] : vector<512x128xf32> to vector<128xf32>
      %21 = vector.shape_cast %20 : vector<128xf32> to vector<1x128xf32>
      %22 = tpu.concatenate %18, %21 in 0 : vector<1x128xf32>, vector<1x128xf32> -> vector<2x128xf32>
      %c0_18 = arith.constant 0 : index
      %c0_19 = arith.constant 0 : index
      %c0_20 = arith.constant 0 : index
      %23 = vector.load %arg6[%c0_18, %c0_19, %c0_20] : memref<1x2x128xf32, #tpu.memory_space<vmem>>, vector<1x2x128xf32>
      %24 = vector.shape_cast %23 : vector<1x2x128xf32> to vector<2x128xf32>
      %25 = vector.shape_cast %22 : vector<2x128xf32> to vector<1x2x128xf32>
      tpu.vector_store %arg6[%c0_18, %c0_19, %c0_20], %25 {strides = array<i32>} : memref<1x2x128xf32, #tpu.memory_space<vmem>>, vector<1x2x128xf32>,
    } else {
    }
    return
  }
  func.func @transform_0(%arg0: i32, %arg1: i32) -> (i32, i32) {
    %c0_i32 = arith.constant 0 : i32
    return %arg0, %arg1 : i32, i32
  }
  func.func @transform_1(%arg0: i32, %arg1: i32) -> (i32, i32) {
    %c0_i32 = arith.constant 0 : i32
    %c0_i32_0 = arith.constant 0 : i32
    return %arg1, %c0_i32 : i32, i32
  }
  func.func @transform_2(%arg0: i32, %arg1: i32) -> (i32, i32) {
    %c0_i32 = arith.constant 0 : i32
    %c0_i32_0 = arith.constant 0 : i32
    %c0_i32_1 = arith.constant 0 : i32
    return %c0_i32, %c0_i32_0 : i32, i32
  }
  func.func @transform_3(%arg0: i32, %arg1: i32) -> (i32, i32) {
    %c0_i32 = arith.constant 0 : i32
    %c0_i32_0 = arith.constant 0 : i32
    return %arg0, %c0_i32 : i32, i32
  }
  func.func @transform_4(%arg0: i32, %arg1: i32) -> (i32, i32, i32) {
    %c0_i32 = arith.constant 0 : i32
    %c0_i32_0 = arith.constant 0 : i32
    %c0_i32_1 = arith.constant 0 : i32
    return %arg0, %c0_i32, %c0_i32_0 : i32, i32, i32
  }
}

</mosaic_0001>

<bundles_post_ra>
// kernel: tpu_custom_call.1
= control target key start
LH: loop header
LB: loop body
LE: loop exit
PB: predicated region body
PF: predicated region fallthrough
CT: control target
= control target key end

     0   :  { %10 = vsyncpa [#allocation4], 0  ;;  %vm219_vm0 = vcmask 293888   ;;  %vm412_vm1 = vcmask 1043456   ;;  %s2258_s0 = inlined_call_operand.vmem [shape: f32[512,36], index: 0, kind: input, shape index: {}]   ;;  %s2259_s1 = inlined_call_operand.vmem [shape: f32[36,128], index: 1, kind: input, shape index: {}]   ;;  %s2260_s2 = inlined_call_operand.vmem [shape: f32[1,128], index: 2, kind: input, shape index: {}]   ;;  %s2261_s3 = inlined_call_operand.hbm [shape: f32[512,128], index: 3, kind: output, shape index: {0}]   ;;  %s2262_s4 = inlined_call_operand.hbm [shape: f32[1,2,128], index: 4, kind: output, shape index: {1}]  }
   0x1   :  { %v214_v0 = vld [vmem:[%s2259_s1] sm:$0xff]  ;;  %v215_v1 = vld [vmem:[%s2259_s1 + $0x8] sm:$0xff]  ;;  %v216_v2 = vld [vmem:[%s2259_s1 + $0x10] sm:$0xff] }
   0x2   :  { %v1607_v3 = vpack.c.bf16 %v215_v1, %v214_v0  ;;  %v217_v4 = vld [vmem:[%s2259_s1 + $0x18] sm:$0xff]  ;;  %v150_v5 = vld [vmem:[%s2258_s0] sm:$0xff]  ;;  %v151_v8 = vld [vmem:[%s2258_s0 + $0x8] sm:$0xff] }
   0x3   :  { %v1611_v6 = vpack.c.bf16 %v217_v4, %v216_v2  ;;  %1511 = vmatprep.mubr.msk.f32.mxu0 %vm219_vm0, %v150_v5  ;;  %v218_v7 = vld [vmem:[%s2259_s1 + $0x20] sm:$0xf]  ;;  %v152_v9 = vld [vmem:[%s2258_s0 + $0x10] sm:$0xff]  ;;  %v183_v11 = vld [vmem:[%s2258_s0 + $0x108] sm:$0xff] }
   0x4   :  { %1608 = vmatprep.subr.bf16.mxu0 %v1607_v3  ;;  %1615 = vmatprep.subr.bf16.mxu1 %v1607_v3  ;;  %v182_v10 = vld [vmem:[%s2258_s0 + $0x100] sm:$0xff]  ;;  %v184_v12 = vld [vmem:[%s2258_s0 + $0x110] sm:$0xff]  ;;  %v153_v13 = vld [vmem:[%s2258_s0 + $0x18] sm:$0xff] }
   0x5   :  { %1610 = vmatpush3.bf16.msra.mxu0 %v1607_v3  ;;  %1618 = vmatpush3.bf16.msra.mxu1 %v1607_v3  ;;  %v154_v14 = vld [vmem:[%s2258_s0 + $0x20] sm:$0xff]  ;;  %v185_v15 = vld [vmem:[%s2258_s0 + $0x118] sm:$0xff]  ;;  %v155_v17 = vld [vmem:[%s2258_s0 + $0x28] sm:$0xff] }
   0x6   :  { %1612 = vmatprep.subr.bf16.mxu0 %v1611_v6  ;;  %1616 = vmatprep.subr.bf16.mxu1 %v1611_v6  ;;  %v186_v16 = vld [vmem:[%s2258_s0 + $0x120] sm:$0xff]  ;;  %v156_v18 = vld [vmem:[%s2258_s0 + $0x30] sm:$0xff]  ;;  %v187_v19 = vld [vmem:[%s2258_s0 + $0x128] sm:$0xff] }
   0x7   :  { %1559 = vmatprep.mubr.msk.f32.mxu1 %vm219_vm0, %v182_v10  ;;  %v188_v20 = vld [vmem:[%s2258_s0 + $0x130] sm:$0xff]  ;;  %v157_v21 = vld [vmem:[%s2258_s0 + $0x38] sm:$0xff]  ;;  %v158_v22 = vld [vmem:[%s2258_s0 + $0x40] sm:$0xff] }
   0x8   :  { %v189_v23 = vld [vmem:[%s2258_s0 + $0x138] sm:$0xff] }
   0x9   :  { %1614 = vmatpush3.bf16.msra.mxu0 %v1611_v6  ;;  %1619 = vmatpush3.bf16.msra.mxu1 %v1611_v6 }
   0xa   :  { %1509 = vmatprep.subr.msk.mxu0 %vm412_vm1, %v218_v7  ;;  %1617 = vmatprep.subr.msk.mxu1 %vm412_vm1, %v218_v7 }
   0xd   :  { %1510 = vmatpush3.msk.msra.mxu0 %vm412_vm1, %v218_v7  ;;  %1620 = vmatpush3.msk.msra.mxu1 %vm412_vm1, %v218_v7 }
   0xe   :  { %1512 = vmatmul.mubr.msk.f32.vlgmr.msra.gmra.mrb[0].mxu0 %vm219_vm0, %v151_v8  ;;  %1560 = vmatmul.mubr.msk.f32.vlgmr.msra.gmra.mrb[0].mxu1 %vm219_vm0, %v183_v11 }
   0xf   :  { %1514 = vmatprep.mubr.msk.f32.mxu0 %vm219_vm0, %v152_v9  ;;  %1562 = vmatprep.mubr.msk.f32.mxu1 %vm219_vm0, %v184_v12 }
  0x12   :  { %1515 = vmatmul.mubr.msk.f32.gmra.mrb[2].mxu0 %vm219_vm0, %v153_v13  ;;  %1563 = vmatmul.mubr.msk.f32.gmra.mrb[2].mxu1 %vm219_vm0, %v185_v15 }
  0x13   :  { %1517 = vmatprep.mubr.msk.f32.mxu0 %vm219_vm0, %v154_v14  ;;  %1565 = vmatprep.mubr.msk.f32.mxu1 %vm219_vm0, %v186_v16 }
  0x16   :  { %1518 = vmatmul.mubr.msk.f32.gmra.mrb[4].mxu0 %vm219_vm0, %v155_v17  ;;  %1566 = vmatmul.mubr.msk.f32.gmra.mrb[4].mxu1 %vm219_vm0, %v187_v19 }
  0x17   :  { %1520 = vmatprep.mubr.msk.f32.mxu0 %vm219_vm0, %v156_v18  ;;  %1568 = vmatprep.mubr.msk.f32.mxu1 %vm219_vm0, %v188_v20 }
  0x18   :  { %11 = vsyncpa [#allocation6], 0  ;;  %v190_v24 = vld [vmem:[%s2258_s0 + $0x140] sm:$0xff]  ;;  %v159_v25 = vld [vmem:[%s2258_s0 + $0x48] sm:$0xff] }
  0x19   :  { %v160_v26 = vld [vmem:[%s2258_s0 + $0x50] sm:$0xff]  ;;  %v191_v27 = vld [vmem:[%s2258_s0 + $0x148] sm:$0xff]  ;;  %v161_v29 = vld [vmem:[%s2258_s0 + $0x58] sm:$0xff] }
  0x1a   :  { %1521 = vmatmul.mubr.msk.f32.gmra.mrb[6].mxu0 %vm219_vm0, %v157_v21  ;;  %1569 = vmatmul.mubr.msk.f32.gmra.mrb[6].mxu1 %vm219_vm0, %v189_v23  ;;  %v192_v28 = vld [vmem:[%s2258_s0 + $0x150] sm:$0xff]  ;;  %v162_v30 = vld [vmem:[%s2258_s0 + $0x60] sm:$0xff]  ;;  %v193_v31 = vld [vmem:[%s2258_s0 + $0x158] sm:$0xff] }
  0x1b   :  { %1523 = vmatprep.mubr.msk.f32.mxu0 %vm219_vm0, %v158_v22  ;;  %1571 = vmatprep.mubr.msk.f32.mxu1 %vm219_vm0, %v190_v24  ;;  %v194_v32 = vld [vmem:[%s2258_s0 + $0x160] sm:$0xff]  ;;  %v163_v33 = vld [vmem:[%s2258_s0 + $0x68] sm:$0xff]  ;;  %v164_v34 = vld [vmem:[%s2258_s0 + $0x70] sm:$0xff] }
  0x1c   :  { %v195_v35 = vld [vmem:[%s2258_s0 + $0x168] sm:$0xff]  ;;  %v196_v36 = vld [vmem:[%s2258_s0 + $0x170] sm:$0xff]  ;;  %v165_v37 = vld [vmem:[%s2258_s0 + $0x78] sm:$0xff] }
  0x1d   :  { %v166_v38 = vld [vmem:[%s2258_s0 + $0x80] sm:$0xff]  ;;  %v197_v39 = vld [vmem:[%s2258_s0 + $0x178] sm:$0xff]  ;;  %v167_v41 = vld [vmem:[%s2258_s0 + $0x88] sm:$0xff] }
  0x1e   :  { %1524 = vmatmul.mubr.msk.f32.gmra.mrb[8].mxu0 %vm219_vm0, %v159_v25  ;;  %1572 = vmatmul.mubr.msk.f32.gmra.mrb[8].mxu1 %vm219_vm0, %v191_v27  ;;  %v198_v40 = vld [vmem:[%s2258_s0 + $0x180] sm:$0xff]  ;;  %v168_v42 = vld [vmem:[%s2258_s0 + $0x90] sm:$0xff]  ;;  %v199_v43 = vld [vmem:[%s2258_s0 + $0x188] sm:$0xff] }
  0x1f   :  { %1526 = vmatprep.mubr.msk.f32.mxu0 %vm219_vm0, %v160_v26  ;;  %1574 = vmatprep.mubr.msk.f32.mxu1 %vm219_vm0, %v192_v28  ;;  %v200_v44 = vld [vmem:[%s2258_s0 + $0x190] sm:$0xff]  ;;  %v169_v45 = vld [vmem:[%s2258_s0 + $0x98] sm:$0xff]  ;;  %v170_v46 = vld [vmem:[%s2258_s0 + $0xa0] sm:$0xff] }
  0x20   :  { %v201_v47 = vld [vmem:[%s2258_s0 + $0x198] sm:$0xff]  ;;  %v202_v48 = vld [vmem:[%s2258_s0 + $0x1a0] sm:$0xff]  ;;  %v171_v49 = vld [vmem:[%s2258_s0 + $0xa8] sm:$0xff] }
  0x21   :  { %v172_v50 = vld [vmem:[%s2258_s0 + $0xb0] sm:$0xff]  ;;  %v203_v51 = vld [vmem:[%s2258_s0 + $0x1a8] sm:$0xff]  ;;  %v173_v53 = vld [vmem:[%s2258_s0 + $0xb8] sm:$0xff] }
  0x22   :  { %1527 = vmatmul.mubr.msk.f32.gmra.mrb[10].mxu0 %vm219_vm0, %v161_v29  ;;  %1575 = vmatmul.mubr.msk.f32.gmra.mrb[10].mxu1 %vm219_vm0, %v193_v31  ;;  %v204_v52 = vld [vmem:[%s2258_s0 + $0x1b0] sm:$0xff]  ;;  %v174_v54 = vld [vmem:[%s2258_s0 + $0xc0] sm:$0xff]  ;;  %v205_v55 = vld [vmem:[%s2258_s0 + $0x1b8] sm:$0xff] }
  0x23   :  { %1529 = vmatprep.mubr.msk.f32.mxu0 %vm219_vm0, %v162_v30  ;;  %1577 = vmatprep.mubr.msk.f32.mxu1 %vm219_vm0, %v194_v32  ;;  %v206_v56 = vld [vmem:[%s2258_s0 + $0x1c0] sm:$0xff]  ;;  %v175_v57 = vld [vmem:[%s2258_s0 + $0xc8] sm:$0xff]  ;;  %v176_v58 = vld [vmem:[%s2258_s0 + $0xd0] sm:$0xff] }
  0x24   :  { %v207_v59 = vld [vmem:[%s2258_s0 + $0x1c8] sm:$0xff]  ;;  %v208_v60 = vld [vmem:[%s2258_s0 + $0x1d0] sm:$0xff]  ;;  %v177_v61 = vld [vmem:[%s2258_s0 + $0xd8] sm:$0xff] }
  0x25   :  { %v178_v62 = vld [vmem:[%s2258_s0 + $0xe0] sm:$0xff]  ;;  %v209_v63 = vld [vmem:[%s2258_s0 + $0x1d8] sm:$0xff]  ;;  %v179_v1 = vld [vmem:[%s2258_s0 + $0xe8] sm:$0xff] }
  0x26   :  { %1530 = vmatmul.mubr.msk.f32.gmra.mrb[12].mxu0 %vm219_vm0, %v163_v33  ;;  %1578 = vmatmul.mubr.msk.f32.gmra.mrb[12].mxu1 %vm219_vm0, %v195_v35  ;;  %v210_v0 = vld [vmem:[%s2258_s0 + $0x1e0] sm:$0xff]  ;;  %v180_v2 = vld [vmem:[%s2258_s0 + $0xf0] sm:$0xff]  ;;  %v211_v3 = vld [vmem:[%s2258_s0 + $0x1e8] sm:$0xff] }
  0x27   :  { %1532 = vmatprep.mubr.msk.f32.mxu0 %vm219_vm0, %v164_v34  ;;  %1580 = vmatprep.mubr.msk.f32.mxu1 %vm219_vm0, %v196_v36  ;;  %v212_v4 = vld [vmem:[%s2258_s0 + $0x1f0] sm:$0xff]  ;;  %v181_v5 = vld [vmem:[%s2258_s0 + $0xf8] sm:$0xff]  ;;  %v1976_v7 = vld [vmem:[%s2260_s2] ss:$0 sm:$0xff] }
  0x28   :  { %v213_v6 = vld [vmem:[%s2258_s0 + $0x1f8] sm:$0xff]  ;;  %s1673_s0 = smov [#allocation3]  }
  0x29   :  { %s1341_s2 = sshll.u32 %s1673_s0, 4  ;;  %s1342_s2 = int_to_ptr.vmem [resolvable:$true] %s1341_s2 }
  0x2a   :  { %1533 = vmatmul.mubr.msk.f32.gmra.mrb[14].mxu0 %vm219_vm0, %v165_v37  ;;  %1581 = vmatmul.mubr.msk.f32.gmra.mrb[14].mxu1 %vm219_vm0, %v197_v39  ;;  %s1625_s20 = scalar_lea.vmem %s1342_s2, 8192  ;;  %p1630_p1 = scmp.lt.s32.totalorder %s1342_s2, %s1342_s2 }
  0x2b   :  { %1535 = vmatprep.mubr.msk.f32.mxu0 %vm219_vm0, %v166_v38  ;;  %1583 = vmatprep.mubr.msk.f32.mxu1 %vm219_vm0, %v198_v40  ;;  %p1626_p0 = scmp.ne.s32.totalorder %s1342_s2, %s1625_s20  ;;  %p1631_p2 = scmp.lt.s32.totalorder %s1625_s20, %s1625_s20 }
  0x2d   :  { %p1632_p3 = por %p1631_p2, %p1630_p1 }
  0x2e   :  { %1536 = vmatmul.mubr.msk.f32.gmra.mrb[16].mxu0 %vm219_vm0, %v167_v41  ;;  %1584 = vmatmul.mubr.msk.f32.gmra.mrb[16].mxu1 %vm219_vm0, %v199_v43 }
  0x2f   :  { %1538 = vmatprep.mubr.msk.f32.mxu0 %vm219_vm0, %v168_v42  ;;  %1586 = vmatprep.mubr.msk.f32.mxu1 %vm219_vm0, %v200_v44  ;;  %p1633_p4 = pnand %p1632_p3, %p1626_p0 }
  0x32   :  { %1539 = vmatmul.mubr.msk.f32.gmra.mrb[18].mxu0 %vm219_vm0, %v169_v45  ;;  %1587 = vmatmul.mubr.msk.f32.gmra.mrb[18].mxu1 %vm219_vm0, %v201_v47 }
  0x33   :  { %1541 = vmatprep.mubr.msk.f32.mxu0 %vm219_vm0, %v170_v46  ;;  %1589 = vmatprep.mubr.msk.f32.mxu1 %vm219_vm0, %v202_v48 }
  0x36   :  { %1542 = vmatmul.mubr.msk.f32.gmra.mrb[20].mxu0 %vm219_vm0, %v171_v49  ;;  %1590 = vmatmul.mubr.msk.f32.gmra.mrb[20].mxu1 %vm219_vm0, %v203_v51 }
  0x37   :  { %1544 = vmatprep.mubr.msk.f32.mxu0 %vm219_vm0, %v172_v50  ;;  %1592 = vmatprep.mubr.msk.f32.mxu1 %vm219_vm0, %v204_v52 }
  0x3a   :  { %1545 = vmatmul.mubr.msk.f32.gmra.mrb[22].mxu0 %vm219_vm0, %v173_v53  ;;  %1593 = vmatmul.mubr.msk.f32.gmra.mrb[22].mxu1 %vm219_vm0, %v205_v55 }
  0x3b   :  { %1547 = vmatprep.mubr.msk.f32.mxu0 %vm219_vm0, %v174_v54  ;;  %1595 = vmatprep.mubr.msk.f32.mxu1 %vm219_vm0, %v206_v56 }
  0x3e   :  { %1548 = vmatmul.mubr.msk.f32.gmra.mrb[24].mxu0 %vm219_vm0, %v175_v57  ;;  %1596 = vmatmul.mubr.msk.f32.gmra.mrb[24].mxu1 %vm219_vm0, %v207_v59 }
  0x3f   :  { %1550 = vmatprep.mubr.msk.f32.mxu0 %vm219_vm0, %v176_v58  ;;  %1598 = vmatprep.mubr.msk.f32.mxu1 %vm219_vm0, %v208_v60 }
  0x42   :  { %1551 = vmatmul.mubr.msk.f32.gmra.mrb[26].mxu0 %vm219_vm0, %v177_v61  ;;  %1599 = vmatmul.mubr.msk.f32.gmra.mrb[26].mxu1 %vm219_vm0, %v209_v63 }
  0x43   :  { %1553 = vmatprep.mubr.msk.f32.mxu0 %vm219_vm0, %v178_v62  ;;  %1601 = vmatprep.mubr.msk.f32.mxu1 %vm219_vm0, %v210_v0 }
  0x46   :  { %1554 = vmatmul.mubr.msk.f32.gmra.mrb[28].mxu0 %vm219_vm0, %v179_v1  ;;  %1602 = vmatmul.mubr.msk.f32.gmra.mrb[28].mxu1 %vm219_vm0, %v211_v3 }
  0x47   :  { %1556 = vmatprep.mubr.msk.f32.mxu0 %vm219_vm0, %v180_v2  ;;  %1604 = vmatprep.mubr.msk.f32.mxu1 %vm219_vm0, %v212_v4 }
  0x4a   :  { %1557 = vmatmul.mubr.msk.f32.gmra.mrb[30].mxu0 %vm219_vm0, %v181_v5  ;;  %1605 = vmatmul.mubr.msk.f32.gmra.mrb[30].mxu1 %vm219_vm0, %v213_v6 }
  0xe1   :  { %v1513_v8 = vpop.f32.mrb[0].mxu0  ;;  %v1561_v11 = vpop.f32.mrb[0].mxu1 }
  0xe2   :  { %v1004_v9 = vadd.f32 %v1513_v8, %v1976_v7  ;;  %v482_v10 = vpop.f32.mrb[1].mxu0  ;;  %v1981_v13 = vadd.f32 %v1561_v11, %v1976_v7  ;;  %v642_v14 = vpop.f32.mrb[1].mxu1 }
  0xe3   :  { %v1003_v12 = vadd.f32 %v1976_v7, %v482_v10  ;;  %v1984_v16 = vadd.f32 %v1976_v7, %v642_v14 }
  0xe4   :  { %1068 = vst [vmem:[#allocation3 + $0x8] sm:$0xff] %v1004_v9  ;;  %v1201_v15 = vmul.f32 %v1004_v9, %v1004_v9  ;;  %1100 = vst [vmem:[#allocation3 + $0x108] sm:$0xff] %v1981_v13 }
  0xe5   :  { %1067 = vst [vmem:[#allocation3] sm:$0xff] %v1003_v12  ;;  %v1131_v17 = vadd.f32 %v1004_v9, %v1003_v12  ;;  %v1200_v18 = vmul.f32 %v1003_v12, %v1003_v12  ;;  %v1516_v19 = vpop.f32.mrb[2].mxu0  ;;  %1099 = vst [vmem:[#allocation3 + $0x100] sm:$0xff] %v1984_v16  ;;  %v1564_v22 = vpop.f32.mrb[2].mxu1 }
  0xe6   :  { %v1006_v20 = vadd.f32 %v1516_v19, %v1976_v7  ;;  %v492_v21 = vpop.f32.mrb[3].mxu0  ;;  %v1991_v25 = vadd.f32 %v1564_v22, %v1976_v7  ;;  %v652_v26 = vpop.f32.mrb[3].mxu1 }
  0xe7   :  { %v1264_v23 = vadd.f32 %v1201_v15, %v1200_v18  ;;  %v1005_v24 = vadd.f32 %v1976_v7, %v492_v21  ;;  %v1994_v27 = vadd.f32 %v1976_v7, %v652_v26 }
  0xe8   :  { %1070 = vst [vmem:[#allocation3 + $0x18] sm:$0xff] %v1006_v20  ;;  %1102 = vst [vmem:[#allocation3 + $0x118] sm:$0xff] %v1991_v25  ;;  %v1203_v31 = vmul.f32 %v1006_v20, %v1006_v20 }
  0xe9   :  { %1069 = vst [vmem:[#allocation3 + $0x10] sm:$0xff] %v1005_v24  ;;  %v1132_v28 = vadd.f32 %v1131_v17, %v1005_v24  ;;  %v1202_v29 = vmul.f32 %v1005_v24, %v1005_v24  ;;  %v1519_v30 = vpop.f32.mrb[4].mxu0  ;;  %1101 = vst [vmem:[#allocation3 + $0x110] sm:$0xff] %v1994_v27  ;;  %v1567_v34 = vpop.f32.mrb[4].mxu1 }
  0xea   :  { %v1008_v32 = vadd.f32 %v1519_v30, %v1976_v7  ;;  %v502_v33 = vpop.f32.mrb[5].mxu0  ;;  %v2001_v38 = vadd.f32 %v1567_v34, %v1976_v7  ;;  %v662_v39 = vpop.f32.mrb[5].mxu1 }
  0xeb   :  { %v1133_v35 = vadd.f32 %v1132_v28, %v1006_v20  ;;  %v1265_v36 = vadd.f32 %v1264_v23, %v1202_v29  ;;  %v1007_v37 = vadd.f32 %v1976_v7, %v502_v33  ;;  %v2004_v40 = vadd.f32 %v1976_v7, %v662_v39 }
  0xec   :  { %1072 = vst [vmem:[#allocation3 + $0x28] sm:$0xff] %v1008_v32  ;;  %1104 = vst [vmem:[#allocation3 + $0x128] sm:$0xff] %v2001_v38  ;;  %v1205_v45 = vmul.f32 %v1008_v32, %v1008_v32 }
  0xed   :  { %v1266_v41 = vadd.f32 %v1265_v36, %v1203_v31  ;;  %1071 = vst [vmem:[#allocation3 + $0x20] sm:$0xff] %v1007_v37  ;;  %v1134_v42 = vadd.f32 %v1133_v35, %v1007_v37  ;;  %v1204_v43 = vmul.f32 %v1007_v37, %v1007_v37  ;;  %v1522_v44 = vpop.f32.mrb[6].mxu0  ;;  %1103 = vst [vmem:[#allocation3 + $0x120] sm:$0xff] %v2004_v40  ;;  %v1570_v48 = vpop.f32.mrb[6].mxu1 }
  0xee   :  { %v1010_v46 = vadd.f32 %v1522_v44, %v1976_v7  ;;  %v512_v47 = vpop.f32.mrb[7].mxu0  ;;  %v2011_v52 = vadd.f32 %v1570_v48, %v1976_v7  ;;  %v672_v53 = vpop.f32.mrb[7].mxu1 }
  0xef   :  { %v1267_v49 = vadd.f32 %v1266_v41, %v1204_v43  ;;  %v1009_v50 = vadd.f32 %v1976_v7, %v512_v47  ;;  %v1135_v51 = vadd.f32 %v1134_v42, %v1008_v32  ;;  %v2014_v54 = vadd.f32 %v1976_v7, %v672_v53 }
  0xf0   :  { %1074 = vst [vmem:[#allocation3 + $0x38] sm:$0xff] %v1010_v46  ;;  %1106 = vst [vmem:[#allocation3 + $0x138] sm:$0xff] %v2011_v52  ;;  %v1207_v59 = vmul.f32 %v1010_v46, %v1010_v46 }
  0xf1   :  { %1073 = vst [vmem:[#allocation3 + $0x30] sm:$0xff] %v1009_v50  ;;  %v1136_v55 = vadd.f32 %v1135_v51, %v1009_v50  ;;  %v1206_v56 = vmul.f32 %v1009_v50, %v1009_v50  ;;  %v1268_v57 = vadd.f32 %v1267_v49, %v1205_v45  ;;  %v1525_v58 = vpop.f32.mrb[8].mxu0  ;;  %1105 = vst [vmem:[#allocation3 + $0x130] sm:$0xff] %v2014_v54  ;;  %v1573_v62 = vpop.f32.mrb[8].mxu1 }
  0xf2   :  { %v1012_v60 = vadd.f32 %v1525_v58, %v1976_v7  ;;  %v522_v61 = vpop.f32.mrb[9].mxu0  ;;  %v2021_v2 = vadd.f32 %v1573_v62, %v1976_v7  ;;  %v682_v3 = vpop.f32.mrb[9].mxu1 }
  0xf3   :  { %v1269_v63 = vadd.f32 %v1268_v57, %v1206_v56  ;;  %v1011_v0 = vadd.f32 %v1976_v7, %v522_v61  ;;  %v1137_v1 = vadd.f32 %v1136_v55, %v1010_v46  ;;  %v2024_v4 = vadd.f32 %v1976_v7, %v682_v3 }
  0xf4   :  { %1076 = vst [vmem:[#allocation3 + $0x48] sm:$0xff] %v1012_v60  ;;  %1108 = vst [vmem:[#allocation3 + $0x148] sm:$0xff] %v2021_v2  ;;  %v1209_v10 = vmul.f32 %v1012_v60, %v1012_v60 }
  0xf5   :  { %1075 = vst [vmem:[#allocation3 + $0x40] sm:$0xff] %v1011_v0  ;;  %v1138_v5 = vadd.f32 %v1137_v1, %v1011_v0  ;;  %v1208_v6 = vmul.f32 %v1011_v0, %v1011_v0  ;;  %v1270_v8 = vadd.f32 %v1269_v63, %v1207_v59  ;;  %v1528_v9 = vpop.f32.mrb[10].mxu0  ;;  %1107 = vst [vmem:[#allocation3 + $0x140] sm:$0xff] %v2024_v4  ;;  %v1576_v14 = vpop.f32.mrb[10].mxu1 }
  0xf6   :  { %v1014_v11 = vadd.f32 %v1528_v9, %v1976_v7  ;;  %v532_v12 = vpop.f32.mrb[11].mxu0  ;;  %v2031_v19 = vadd.f32 %v1576_v14, %v1976_v7  ;;  %v692_v20 = vpop.f32.mrb[11].mxu1 }
  0xf7   :  { %v1271_v15 = vadd.f32 %v1270_v8, %v1208_v6  ;;  %v1013_v17 = vadd.f32 %v1976_v7, %v532_v12  ;;  %v1139_v18 = vadd.f32 %v1138_v5, %v1012_v60  ;;  %v2034_v21 = vadd.f32 %v1976_v7, %v692_v20 }
  0xf8   :  { %1078 = vst [vmem:[#allocation3 + $0x58] sm:$0xff] %v1014_v11  ;;  %1110 = vst [vmem:[#allocation3 + $0x158] sm:$0xff] %v2031_v19  ;;  %v1211_v28 = vmul.f32 %v1014_v11, %v1014_v11 }
  0xf9   :  { %1077 = vst [vmem:[#allocation3 + $0x50] sm:$0xff] %v1013_v17  ;;  %v1140_v22 = vadd.f32 %v1139_v18, %v1013_v17  ;;  %v1210_v23 = vmul.f32 %v1013_v17, %v1013_v17  ;;  %v1272_v24 = vadd.f32 %v1271_v15, %v1209_v10  ;;  %v1531_v26 = vpop.f32.mrb[12].mxu0  ;;  %1109 = vst [vmem:[#allocation3 + $0x150] sm:$0xff] %v2034_v21  ;;  %v1579_v31 = vpop.f32.mrb[12].mxu1 }
  0xfa   :  { %v1016_v29 = vadd.f32 %v1531_v26, %v1976_v7  ;;  %v542_v30 = vpop.f32.mrb[13].mxu0  ;;  %v2041_v35 = vadd.f32 %v1579_v31, %v1976_v7  ;;  %v702_v36 = vpop.f32.mrb[13].mxu1 }
  0xfb   :  { %v1273_v32 = vadd.f32 %v1272_v24, %v1210_v23  ;;  %v1015_v33 = vadd.f32 %v1976_v7, %v542_v30  ;;  %v1141_v34 = vadd.f32 %v1140_v22, %v1014_v11  ;;  %v2044_v37 = vadd.f32 %v1976_v7, %v702_v36 }
  0xfc   :  { %1080 = vst [vmem:[#allocation3 + $0x68] sm:$0xff] %v1016_v29  ;;  %1112 = vst [vmem:[#allocation3 + $0x168] sm:$0xff] %v2041_v35  ;;  %v1213_v44 = vmul.f32 %v1016_v29, %v1016_v29 }
  0xfd   :  { %1079 = vst [vmem:[#allocation3 + $0x60] sm:$0xff] %v1015_v33  ;;  %v1142_v39 = vadd.f32 %v1141_v34, %v1015_v33  ;;  %v1212_v41 = vmul.f32 %v1015_v33, %v1015_v33  ;;  %v1274_v42 = vadd.f32 %v1273_v32, %v1211_v28  ;;  %v1534_v43 = vpop.f32.mrb[14].mxu0  ;;  %1111 = vst [vmem:[#allocation3 + $0x160] sm:$0xff] %v2044_v37  ;;  %v1582_v47 = vpop.f32.mrb[14].mxu1 }
  0xfe   :  { %v1018_v45 = vadd.f32 %v1534_v43, %v1976_v7  ;;  %v552_v46 = vpop.f32.mrb[15].mxu0  ;;  %v2051_v51 = vadd.f32 %v1582_v47, %v1976_v7  ;;  %v712_v53 = vpop.f32.mrb[15].mxu1 }
  0xff   :  { %v1275_v48 = vadd.f32 %v1274_v42, %v1212_v41  ;;  %v1017_v49 = vadd.f32 %v1976_v7, %v552_v46  ;;  %v1143_v50 = vadd.f32 %v1142_v39, %v1016_v29  ;;  %v2054_v55 = vadd.f32 %v1976_v7, %v712_v53 }
 0x100   :  { %1082 = vst [vmem:[#allocation3 + $0x78] sm:$0xff] %v1018_v45  ;;  %1114 = vst [vmem:[#allocation3 + $0x178] sm:$0xff] %v2051_v51  ;;  %v1215_v60 = vmul.f32 %v1018_v45, %v1018_v45 }
 0x101   :  { %1081 = vst [vmem:[#allocation3 + $0x70] sm:$0xff] %v1017_v49  ;;  %v1144_v56 = vadd.f32 %v1143_v50, %v1017_v49  ;;  %v1214_v57 = vmul.f32 %v1017_v49, %v1017_v49  ;;  %v1276_v58 = vadd.f32 %v1275_v48, %v1213_v44  ;;  %v1537_v59 = vpop.f32.mrb[16].mxu0  ;;  %1113 = vst [vmem:[#allocation3 + $0x170] sm:$0xff] %v2054_v55  ;;  %v1585_v63 = vpop.f32.mrb[16].mxu1 }
 0x102   :  { %v1020_v61 = vadd.f32 %v1537_v59, %v1976_v7  ;;  %v562_v62 = vpop.f32.mrb[17].mxu0  ;;  %v2061_v5 = vadd.f32 %v1585_v63, %v1976_v7  ;;  %v722_v6 = vpop.f32.mrb[17].mxu1 }
 0x103   :  { %v1277_v0 = vadd.f32 %v1276_v58, %v1214_v57  ;;  %v1019_v1 = vadd.f32 %v1976_v7, %v562_v62  ;;  %v1145_v3 = vadd.f32 %v1144_v56, %v1018_v45  ;;  %v2064_v8 = vadd.f32 %v1976_v7, %v722_v6 }
 0x104   :  { %1084 = vst [vmem:[#allocation3 + $0x88] sm:$0xff] %v1020_v61  ;;  %1116 = vst [vmem:[#allocation3 + $0x188] sm:$0xff] %v2061_v5  ;;  %v1217_v14 = vmul.f32 %v1020_v61, %v1020_v61 }
 0x105   :  { %1083 = vst [vmem:[#allocation3 + $0x80] sm:$0xff] %v1019_v1  ;;  %v1146_v9 = vadd.f32 %v1145_v3, %v1019_v1  ;;  %v1216_v10 = vmul.f32 %v1019_v1, %v1019_v1  ;;  %v1278_v11 = vadd.f32 %v1277_v0, %v1215_v60  ;;  %v1540_v12 = vpop.f32.mrb[18].mxu0  ;;  %1115 = vst [vmem:[#allocation3 + $0x180] sm:$0xff] %v2064_v8  ;;  %v1588_v18 = vpop.f32.mrb[18].mxu1 }
 0x106   :  { %v1022_v15 = vadd.f32 %v1540_v12, %v1976_v7  ;;  %v572_v17 = vpop.f32.mrb[19].mxu0  ;;  %v2071_v24 = vadd.f32 %v1588_v18, %v1976_v7  ;;  %v732_v26 = vpop.f32.mrb[19].mxu1 }
 0x107   :  { %v1279_v20 = vadd.f32 %v1278_v11, %v1216_v10  ;;  %v1021_v22 = vadd.f32 %v1976_v7, %v572_v17  ;;  %v1147_v23 = vadd.f32 %v1146_v9, %v1020_v61  ;;  %v2074_v28 = vadd.f32 %v1976_v7, %v732_v26 }
 0x108   :  { %1086 = vst [vmem:[#allocation3 + $0x98] sm:$0xff] %v1022_v15  ;;  %1118 = vst [vmem:[#allocation3 + $0x198] sm:$0xff] %v2071_v24  ;;  %v1219_v33 = vmul.f32 %v1022_v15, %v1022_v15 }
 0x109   :  { %1085 = vst [vmem:[#allocation3 + $0x90] sm:$0xff] %v1021_v22  ;;  %v1148_v29 = vadd.f32 %v1147_v23, %v1021_v22  ;;  %v1218_v30 = vmul.f32 %v1021_v22, %v1021_v22  ;;  %v1280_v31 = vadd.f32 %v1279_v20, %v1217_v14  ;;  %v1543_v32 = vpop.f32.mrb[20].mxu0  ;;  %1117 = vst [vmem:[#allocation3 + $0x190] sm:$0xff] %v2074_v28  ;;  %v1591_v39 = vpop.f32.mrb[20].mxu1 }
 0x10a   :  { %v1024_v34 = vadd.f32 %v1543_v32, %v1976_v7  ;;  %v582_v36 = vpop.f32.mrb[21].mxu0  ;;  %v2081_v44 = vadd.f32 %v1591_v39, %v1976_v7  ;;  %v742_v45 = vpop.f32.mrb[21].mxu1 }
 0x10b   :  { %v1281_v41 = vadd.f32 %v1280_v31, %v1218_v30  ;;  %v1023_v42 = vadd.f32 %v1976_v7, %v582_v36  ;;  %v1149_v43 = vadd.f32 %v1148_v29, %v1022_v15  ;;  %v2084_v46 = vadd.f32 %v1976_v7, %v742_v45 }
 0x10c   :  { %1088 = vst [vmem:[#allocation3 + $0xa8] sm:$0xff] %v1024_v34  ;;  %1120 = vst [vmem:[#allocation3 + $0x1a8] sm:$0xff] %v2081_v44  ;;  %v1221_v53 = vmul.f32 %v1024_v34, %v1024_v34 }
 0x10d   :  { %1087 = vst [vmem:[#allocation3 + $0xa0] sm:$0xff] %v1023_v42  ;;  %v1150_v47 = vadd.f32 %v1149_v43, %v1023_v42  ;;  %v1220_v48 = vmul.f32 %v1023_v42, %v1023_v42  ;;  %v1282_v49 = vadd.f32 %v1281_v41, %v1219_v33  ;;  %v1546_v50 = vpop.f32.mrb[22].mxu0  ;;  %1119 = vst [vmem:[#allocation3 + $0x1a0] sm:$0xff] %v2084_v46  ;;  %v1594_v58 = vpop.f32.mrb[22].mxu1 }
 0x10e   :  { %v1026_v56 = vadd.f32 %v1546_v50, %v1976_v7  ;;  %v592_v57 = vpop.f32.mrb[23].mxu0  ;;  %v2091_v62 = vadd.f32 %v1594_v58, %v1976_v7  ;;  %v752_v63 = vpop.f32.mrb[23].mxu1 }
 0x10f   :  { %v1283_v59 = vadd.f32 %v1282_v49, %v1220_v48  ;;  %v1025_v60 = vadd.f32 %v1976_v7, %v592_v57  ;;  %v1151_v61 = vadd.f32 %v1150_v47, %v1024_v34  ;;  %v2094_v0 = vadd.f32 %v1976_v7, %v752_v63 }
 0x110   :  { %1090 = vst [vmem:[#allocation3 + $0xb8] sm:$0xff] %v1026_v56  ;;  %1122 = vst [vmem:[#allocation3 + $0x1b8] sm:$0xff] %v2091_v62  ;;  %v1223_v10 = vmul.f32 %v1026_v56, %v1026_v56 }
 0x111   :  { %1089 = vst [vmem:[#allocation3 + $0xb0] sm:$0xff] %v1025_v60  ;;  %v1152_v1 = vadd.f32 %v1151_v61, %v1025_v60  ;;  %v1222_v3 = vmul.f32 %v1025_v60, %v1025_v60  ;;  %v1284_v6 = vadd.f32 %v1283_v59, %v1221_v53  ;;  %v1549_v9 = vpop.f32.mrb[24].mxu0  ;;  %1121 = vst [vmem:[#allocation3 + $0x1b0] sm:$0xff] %v2094_v0  ;;  %v1597_v14 = vpop.f32.mrb[24].mxu1 }
 0x112   :  { %v1028_v11 = vadd.f32 %v1549_v9, %v1976_v7  ;;  %v602_v12 = vpop.f32.mrb[25].mxu0  ;;  %v2101_v20 = vadd.f32 %v1597_v14, %v1976_v7  ;;  %v762_v22 = vpop.f32.mrb[25].mxu1 }
 0x113   :  { %v1285_v15 = vadd.f32 %v1284_v6, %v1222_v3  ;;  %v1027_v17 = vadd.f32 %v1976_v7, %v602_v12  ;;  %v1153_v18 = vadd.f32 %v1152_v1, %v1026_v56  ;;  %v2104_v23 = vadd.f32 %v1976_v7, %v762_v22 }
 0x114   :  { %1092 = vst [vmem:[#allocation3 + $0xc8] sm:$0xff] %v1028_v11  ;;  %1124 = vst [vmem:[#allocation3 + $0x1c8] sm:$0xff] %v2101_v20  ;;  %v1225_v32 = vmul.f32 %v1028_v11, %v1028_v11 }
 0x115   :  { %1091 = vst [vmem:[#allocation3 + $0xc0] sm:$0xff] %v1027_v17  ;;  %v1154_v26 = vadd.f32 %v1153_v18, %v1027_v17  ;;  %v1224_v29 = vmul.f32 %v1027_v17, %v1027_v17  ;;  %v1286_v30 = vadd.f32 %v1285_v15, %v1223_v10  ;;  %v1552_v31 = vpop.f32.mrb[26].mxu0  ;;  %1123 = vst [vmem:[#allocation3 + $0x1c0] sm:$0xff] %v2104_v23  ;;  %v1600_v36 = vpop.f32.mrb[26].mxu1 }
 0x116   :  { %v1030_v33 = vadd.f32 %v1552_v31, %v1976_v7  ;;  %v612_v34 = vpop.f32.mrb[27].mxu0  ;;  %v2111_v43 = vadd.f32 %v1600_v36, %v1976_v7  ;;  %v772_v45 = vpop.f32.mrb[27].mxu1 }
 0x117   :  { %v1287_v39 = vadd.f32 %v1286_v30, %v1224_v29  ;;  %v1029_v41 = vadd.f32 %v1976_v7, %v612_v34  ;;  %v1155_v42 = vadd.f32 %v1154_v26, %v1028_v11  ;;  %v2114_v47 = vadd.f32 %v1976_v7, %v772_v45 }
 0x118   :  { %1094 = vst [vmem:[#allocation3 + $0xd8] sm:$0xff] %v1030_v33  ;;  %1126 = vst [vmem:[#allocation3 + $0x1d8] sm:$0xff] %v2111_v43  ;;  %v1227_v56 = vmul.f32 %v1030_v33, %v1030_v33  ;;  %v1232_v45 = vmul.f32 %v1984_v16, %v1984_v16 }
 0x119   :  { %1093 = vst [vmem:[#allocation3 + $0xd0] sm:$0xff] %v1029_v41  ;;  %v1156_v48 = vadd.f32 %v1155_v42, %v1029_v41  ;;  %v1226_v49 = vmul.f32 %v1029_v41, %v1029_v41  ;;  %v1288_v50 = vadd.f32 %v1287_v39, %v1225_v32  ;;  %v1555_v53 = vpop.f32.mrb[28].mxu0  ;;  %1125 = vst [vmem:[#allocation3 + $0x1d0] sm:$0xff] %v2114_v47  ;;  %v1603_v59 = vpop.f32.mrb[28].mxu1 }
 0x11a   :  { %v1032_v57 = vadd.f32 %v1555_v53, %v1976_v7  ;;  %v622_v58 = vpop.f32.mrb[29].mxu0  ;;  %v2121_v1 = vadd.f32 %v1603_v59, %v1976_v7  ;;  %v782_v3 = vpop.f32.mrb[29].mxu1 }
 0x11b   :  { %v1289_v60 = vadd.f32 %v1288_v50, %v1226_v49  ;;  %v1031_v61 = vadd.f32 %v1976_v7, %v622_v58  ;;  %v1157_v63 = vadd.f32 %v1156_v48, %v1030_v33  ;;  %v2124_v6 = vadd.f32 %v1976_v7, %v782_v3 }
 0x11c   :  { %1096 = vst [vmem:[#allocation3 + $0xe8] sm:$0xff] %v1032_v57  ;;  %1128 = vst [vmem:[#allocation3 + $0x1e8] sm:$0xff] %v2121_v1  ;;  %v1229_v14 = vmul.f32 %v1032_v57, %v1032_v57 }
 0x11d   :  { %1095 = vst [vmem:[#allocation3 + $0xe0] sm:$0xff] %v1031_v61  ;;  %v1158_v9 = vadd.f32 %v1157_v63, %v1031_v61  ;;  %v1228_v10 = vmul.f32 %v1031_v61, %v1031_v61  ;;  %v1290_v11 = vadd.f32 %v1289_v60, %v1227_v56  ;;  %v1558_v12 = vpop.f32.mrb[30].mxu0  ;;  %1127 = vst [vmem:[#allocation3 + $0x1e0] sm:$0xff] %v2124_v6  ;;  %v1606_v18 = vpop.f32.mrb[30].mxu1 }
 0x11e   :  { %v1034_v15 = vadd.f32 %v1558_v12, %v1976_v7  ;;  %v632_v17 = vpop.f32.mrb[31].mxu0  ;;  %v2131_v30 = vadd.f32 %v1606_v18, %v1976_v7  ;;  %v792_v31 = vpop.f32.mrb[31].mxu1 }
 0x11f   :  { %v1291_v22 = vadd.f32 %v1290_v11, %v1228_v10  ;;  %v1033_v26 = vadd.f32 %v1976_v7, %v632_v17  ;;  %v1159_v29 = vadd.f32 %v1158_v9, %v1032_v57  ;;  %v2134_v32 = vadd.f32 %v1976_v7, %v792_v31 }
 0x120   :  { %1098 = vst [vmem:[#allocation3 + $0xf8] sm:$0xff] %v1034_v15  ;;  %1130 = vst [vmem:[#allocation3 + $0x1f8] sm:$0xff] %v2131_v30  ;;  %v1231_v39 = vmul.f32 %v1034_v15, %v1034_v15 }
 0x121   :  { %1097 = vst [vmem:[#allocation3 + $0xf0] sm:$0xff] %v1033_v26  ;;  %v1160_v33 = vadd.f32 %v1159_v29, %v1033_v26  ;;  %v1230_v34 = vmul.f32 %v1033_v26, %v1033_v26  ;;  %v1292_v36 = vadd.f32 %v1291_v22, %v1229_v14  ;;  %1129 = vst [vmem:[#allocation3 + $0x1f0] sm:$0xff] %v2134_v32 }
 0x123   :  { %v1293_v41 = vadd.f32 %v1292_v36, %v1230_v34  ;;  %v1161_v42 = vadd.f32 %v1160_v33, %v1034_v15 }
 0x124   :  { %1636 = shalt.err (!%p1633_p4)
}
 0x125   :  { %s1637_s23 = scalar_lea.hbm %s2261_s3, 8192 }
 0x126   :  { %p1638_p5 = scmp.ne.s32.totalorder %s2261_s3, %s1637_s23  ;;  %p1641_p6 = scmp.lt.u32.totalorder %s1637_s23, %s2261_s3 }
 0x128   :  { %p1643_p7 = pnand %p1641_p6, %p1638_p5 }
 0x12a   :  { %1646 = shalt.err (!%p1643_p7)
}
 0x12b   :  { %s1674_s28 = smov 128   ;;  %s1675_s29 = smov 8   ;;  %v1162_v7 = vadd.f32 %v1161_v42, %v1984_v16  ;;  %v1294_v48 = vadd.f32 %v1293_v41, %v1231_v39  ;;  %v1233_v49 = vmul.f32 %v1981_v13, %v1981_v13  ;;  %v1234_v56 = vmul.f32 %v1994_v27, %v1994_v27 }
 0x12c   :  { %1347 = dma.vmem_to_hbm [thread:$0]  %s1342_s2, 8192, %s2261_s3, [#allocation4], %s1674_s28, %s1674_s28, %s1675_s29   ;;  %v1235_v59 = vmul.f32 %v1991_v25, %v1991_v25  ;;  %v1236_v16 = vmul.f32 %v2004_v40, %v2004_v40  ;;  %vm1333_vm2 = vcmask 1040384  }
 0x12d   :  { %v1295_v50 = vadd.f32 %v1294_v48, %v1232_v45  ;;  %v1163_v53 = vadd.f32 %v1162_v7, %v1981_v13  ;;  %v1237_v13 = vmul.f32 %v2001_v38, %v2001_v38  ;;  %s1676_s3 = smov [#allocation5]  }
 0x12e   :  { %s1354_s6 = sshll.u32 %s1676_s3, 4  ;;  %s1355_s6 = int_to_ptr.vmem [resolvable:$true] %s1354_s6 }
 0x12f   :  { %v1164_v57 = vadd.f32 %v1163_v53, %v1994_v27  ;;  %v1296_v58 = vadd.f32 %v1295_v50, %v1233_v49  ;;  %v1238_v27 = vmul.f32 %v2014_v54, %v2014_v54  ;;  %s1647_s1 = scalar_lea.vmem %s1355_s6, 32  ;;  %p1652_p9 = scmp.lt.s32.totalorder %s1355_s6, %s1355_s6 }
 0x130   :  { %p1648_p8 = scmp.ne.s32.totalorder %s1355_s6, %s1647_s1  ;;  %p1653_p10 = scmp.lt.s32.totalorder %s1647_s1, %s1647_s1 }
 0x131   :  { %v1297_v60 = vadd.f32 %v1296_v58, %v1234_v56  ;;  %v1165_v61 = vadd.f32 %v1164_v57, %v1991_v25  ;;  %v1239_v25 = vmul.f32 %v2011_v52, %v2011_v52 }
 0x132   :  { %p1654_p11 = por %p1653_p10, %p1652_p9 }
 0x133   :  { %v1166_v63 = vadd.f32 %v1165_v61, %v2004_v40  ;;  %v1298_v3 = vadd.f32 %v1297_v60, %v1235_v59  ;;  %v1240_v40 = vmul.f32 %v2024_v4, %v2024_v4 }
 0x134   :  { %p1655_p12 = pnand %p1654_p11, %p1648_p8 }
 0x135   :  { %v1299_v9 = vadd.f32 %v1298_v3, %v1236_v16  ;;  %v1167_v10 = vadd.f32 %v1166_v63, %v2001_v38  ;;  %v1241_v38 = vmul.f32 %v2021_v2, %v2021_v2 }
 0x137   :  { %v1168_v11 = vadd.f32 %v1167_v10, %v2014_v54  ;;  %v1300_v12 = vadd.f32 %v1299_v9, %v1237_v13  ;;  %v1242_v54 = vmul.f32 %v2034_v21, %v2034_v21 }
 0x139   :  { %v1301_v14 = vadd.f32 %v1300_v12, %v1238_v27  ;;  %v1169_v15 = vadd.f32 %v1168_v11, %v2011_v52  ;;  %v1243_v52 = vmul.f32 %v2031_v19, %v2031_v19 }
 0x13b   :  { %v1170_v17 = vadd.f32 %v1169_v15, %v2024_v4  ;;  %v1302_v18 = vadd.f32 %v1301_v14, %v1239_v25  ;;  %v1244_v4 = vmul.f32 %v2044_v37, %v2044_v37 }
 0x13d   :  { %v1303_v22 = vadd.f32 %v1302_v18, %v1240_v40  ;;  %v1171_v26 = vadd.f32 %v1170_v17, %v2021_v2  ;;  %v1245_v2 = vmul.f32 %v2041_v35, %v2041_v35 }
 0x13f   :  { %v1172_v29 = vadd.f32 %v1171_v26, %v2034_v21  ;;  %v1304_v31 = vadd.f32 %v1303_v22, %v1241_v38  ;;  %v1246_v21 = vmul.f32 %v2054_v55, %v2054_v55 }
 0x141   :  { %v1305_v33 = vadd.f32 %v1304_v31, %v1242_v54  ;;  %v1173_v34 = vadd.f32 %v1172_v29, %v2031_v19  ;;  %v1247_v19 = vmul.f32 %v2051_v51, %v2051_v51 }
 0x143   :  { %v1174_v36 = vadd.f32 %v1173_v34, %v2044_v37  ;;  %v1306_v39 = vadd.f32 %v1305_v33, %v1243_v52  ;;  %v1248_v37 = vmul.f32 %v2064_v8, %v2064_v8 }
 0x145   :  { %v1307_v41 = vadd.f32 %v1306_v39, %v1244_v4  ;;  %v1175_v42 = vadd.f32 %v1174_v36, %v2041_v35  ;;  %v1249_v35 = vmul.f32 %v2061_v5, %v2061_v5 }
 0x147   :  { %v1176_v45 = vadd.f32 %v1175_v42, %v2054_v55  ;;  %v1308_v7 = vadd.f32 %v1307_v41, %v1245_v2  ;;  %v1250_v55 = vmul.f32 %v2074_v28, %v2074_v28 }
 0x149   :  { %v1309_v48 = vadd.f32 %v1308_v7, %v1246_v21  ;;  %v1177_v49 = vadd.f32 %v1176_v45, %v2051_v51  ;;  %v1251_v51 = vmul.f32 %v2071_v24, %v2071_v24 }
 0x14b   :  { %v1178_v50 = vadd.f32 %v1177_v49, %v2064_v8  ;;  %v1310_v53 = vadd.f32 %v1309_v48, %v1247_v19  ;;  %v1252_v8 = vmul.f32 %v2084_v46, %v2084_v46 }
 0x14d   :  { %v1311_v56 = vadd.f32 %v1310_v53, %v1248_v37  ;;  %v1179_v57 = vadd.f32 %v1178_v50, %v2061_v5  ;;  %v1253_v5 = vmul.f32 %v2081_v44, %v2081_v44 }
 0x14f   :  { %v1180_v58 = vadd.f32 %v1179_v57, %v2074_v28  ;;  %v1312_v59 = vadd.f32 %v1311_v56, %v1249_v35  ;;  %v1254_v28 = vmul.f32 %v2094_v0, %v2094_v0 }
 0x151   :  { %v1313_v60 = vadd.f32 %v1312_v59, %v1250_v55  ;;  %v1181_v61 = vadd.f32 %v1180_v58, %v2071_v24  ;;  %v1255_v24 = vmul.f32 %v2091_v62, %v2091_v62 }
 0x153   :  { %v1182_v16 = vadd.f32 %v1181_v61, %v2084_v46  ;;  %v1314_v63 = vadd.f32 %v1313_v60, %v1251_v51  ;;  %v1256_v46 = vmul.f32 %v2104_v23, %v2104_v23 }
 0x155   :  { %v1315_v3 = vadd.f32 %v1314_v63, %v1252_v8  ;;  %v1183_v13 = vadd.f32 %v1182_v16, %v2081_v44  ;;  %v1257_v44 = vmul.f32 %v2101_v20, %v2101_v20 }
 0x157   :  { %v1184_v9 = vadd.f32 %v1183_v13, %v2094_v0  ;;  %v1316_v10 = vadd.f32 %v1315_v3, %v1253_v5  ;;  %v1258_v0 = vmul.f32 %v2114_v47, %v2114_v47 }
 0x159   :  { %v1317_v27 = vadd.f32 %v1316_v10, %v1254_v28  ;;  %v1185_v11 = vadd.f32 %v1184_v9, %v2091_v62  ;;  %v1259_v62 = vmul.f32 %v2111_v43, %v2111_v43 }
 0x15b   :  { %v1186_v12 = vadd.f32 %v1185_v11, %v2104_v23  ;;  %v1318_v25 = vadd.f32 %v1317_v27, %v1255_v24  ;;  %v1260_v23 = vmul.f32 %v2124_v6, %v2124_v6 }
 0x15d   :  { %v1319_v14 = vadd.f32 %v1318_v25, %v1256_v46  ;;  %v1187_v15 = vadd.f32 %v1186_v12, %v2101_v20  ;;  %v1261_v20 = vmul.f32 %v2121_v1, %v2121_v1 }
 0x15f   :  { %v1188_v40 = vadd.f32 %v1187_v15, %v2114_v47  ;;  %v1320_v17 = vadd.f32 %v1319_v14, %v1257_v44  ;;  %v1262_v47 = vmul.f32 %v2134_v32, %v2134_v32 }
 0x161   :  { %v1321_v18 = vadd.f32 %v1320_v17, %v1258_v0  ;;  %v1189_v38 = vadd.f32 %v1188_v40, %v2111_v43  ;;  %v1263_v43 = vmul.f32 %v2131_v30, %v2131_v30 }
 0x163   :  { %v1190_v22 = vadd.f32 %v1189_v38, %v2124_v6  ;;  %v1322_v26 = vadd.f32 %v1321_v18, %v1259_v62 }
 0x165   :  { %v1323_v54 = vadd.f32 %v1322_v26, %v1260_v23  ;;  %v1191_v29 = vadd.f32 %v1190_v22, %v2121_v1 }
 0x167   :  { %v1192_v31 = vadd.f32 %v1191_v29, %v2134_v32  ;;  %v1324_v52 = vadd.f32 %v1323_v54, %v1261_v20 }
 0x169   :  { %v1193_v33 = vadd.f32 %v1192_v31, %v2131_v30  ;;  %v1325_v34 = vadd.f32 %v1324_v52, %v1262_v47 }
 0x16b   :  { %v1194_v6 = vrot.slane %v1193_v33, 4  ;;  %v1326_v4 = vadd.f32 %v1325_v34, %v1263_v43 }
 0x16d   :  { %v1195_v36 = vadd.f32 %v1194_v6, %v1193_v33  ;;  %v1327_v39 = vrot.slane %v1326_v4, 4 }
 0x16f   :  { %v1196_v2 = vrot.slane %v1195_v36, 2  ;;  %v1328_v41 = vadd.f32 %v1327_v39, %v1326_v4 }
 0x171   :  { %v1197_v42 = vadd.f32 %v1196_v2, %v1195_v36  ;;  %v1329_v1 = vrot.slane %v1328_v41, 2 }
 0x173   :  { %v1198_v21 = vrot.slane %v1197_v42, 1  ;;  %v1330_v45 = vadd.f32 %v1329_v1, %v1328_v41 }
 0x175   :  { %v1331_v7 = vrot.slane %v1330_v45, 1  ;;  %v1199_v32 = vadd.f32 %v1198_v21, %v1197_v42 }
 0x177   :  { %v1332_v19 = vadd.f32 %v1331_v7, %v1330_v45 }
 0x179   :  { %v1334_v48 = vsel %vm1333_vm2, %v1199_v32, %v1332_v19 }
 0x17a   :  { %1335 = vst [vmem:[#allocation5] sm:$0x3] %v1334_v48 }
 0x17b   :  { %1658 = shalt.err (!%p1655_p12)
}
 0x17c   :  { %s1659_s9 = scalar_lea.hbm %s2262_s4, 32 }
 0x17d   :  { %p1660_p13 = scmp.ne.s32.totalorder %s2262_s4, %s1659_s9  ;;  %p1663_p0 = scmp.lt.u32.totalorder %s1659_s9, %s2262_s4 }
 0x17f   :  { %p1665_p1 = pnand %p1663_p0, %p1660_p13 }
 0x181   :  { %1668 = shalt.err (!%p1665_p1)
}
 0x182   :  { %1357 = dma.vmem_to_hbm [thread:$0]  %s1355_s6, 32, %s2262_s4, [#allocation6]  }
 0x183   :  { %1669 = dma.done.wait [#allocation4], 8192  }
 0x184   :  { %1670 = vsyncadd [#allocation4], 4294959104 }
 0x185   :  { %1671 = dma.done.wait [#allocation6], 32  }
 0x186   :  { %1672 = vsyncadd [#allocation6], 4294967264 }
 0x187   :  { %1364 = vsyncpa [#allocation4], 1 }
 0x188   :  { %1365 = vsyncpa [#allocation6], 1 }

</bundles_post_ra>
